<compile_context>
chip_gen: v6e
topology: v6e:2x2x1
jax: 0.10.0
libtpu: 0.0.40
codegen_flags: <defaults>
</compile_context>

<pallas_src>
import jax
import jax.numpy as jnp
from jax.experimental import pallas as pl
from jax.experimental.pallas import tpu as pltpu


def _round_up(x, m):
    return ((x + m - 1) // m) * m


def _cdiv(a, b):
    return (a + b - 1) // b


def _sublane_multiple(dtype):
    # Second-minor tile size: f32 -> 8, bf16 -> 16, int8/fp8 -> 32.
    return max(8, 32 // jnp.dtype(dtype).itemsize)


def _vmem_capacity_bytes():
    try:
        return int(pltpu.get_tpu_info().vmem_capacity_bytes)
    except Exception:
        return 64 * 1024 * 1024  # conservative (v7x-sized) fallback


def _branch(x0, x1, w_ref, b_row, EH):
    """relu( cat(x0, x1, axis=-1) @ W + b ) with f32 accumulation."""
    if EH <= 128:
        # K = EH is below the MXU systolic depth: merge into one K=2*EH pass
        # (in-VMEM lane concat is a cheap relayout; halves vmatmul count).
        x = jnp.concatenate([x0, x1], axis=-1)
        o = jnp.dot(x, w_ref[...], preferred_element_type=jnp.float32)
    else:
        # Full-depth K: split-sum over the two direction slabs (static slices).
        o = jnp.dot(x0, w_ref[:EH, :], preferred_element_type=jnp.float32)
        o = o + jnp.dot(x1, w_ref[EH:, :], preferred_element_type=jnp.float32)
    return jnp.maximum(o + b_row, 0.0)


def _kernel_split(h0, h1, c0, c1, wh, wc, bh, bc, oh_ref, oc_ref):
    # Two separate lane-dense outputs (DH >= 128).
    EH = h0.shape[1]
    oh_ref[...] = _branch(h0[...], h1[...], wh, bh[...], EH).astype(oh_ref.dtype)
    oc_ref[...] = _branch(c0[...], c1[...], wc, bc[...], EH).astype(oc_ref.dtype)


def _kernel_fused(h0, h1, c0, c1, wh, wc, bh, bc, o_ref):
    # Fused (TM, 2*DH) output for small DH (< 128) so the store stays wide.
    EH = h0.shape[1]
    oh = _branch(h0[...], h1[...], wh, bh[...], EH)
    oc = _branch(c0[...], c1[...], wc, bc[...], EH)
    o_ref[...] = jnp.concatenate([oh, oc], axis=-1).astype(o_ref.dtype)


def reduce_encoder(hidden, cell, wh, bh, wc, bc, *, block_b=None,
                   compute_dtype=None):
    """hidden, cell: (2, B, EH); wh/wc: (2*EH, DH); bh/bc: (DH,).

    compute_dtype: optionally cast activations/weights (jnp.bfloat16 is
    recommended on v6e/v7x) for MXU-native matmuls and half the DMA bytes;
    accumulation and the bias/ReLU epilogue stay f32.
    """
    assert hidden.shape == cell.shape and hidden.shape[0] == 2
    _, B, EH = hidden.shape
    K, DH = wh.shape
    assert K == 2 * EH and wc.shape == (K, DH)
    assert bh.shape == (DH,) and bc.shape == (DH,)
    out_dtype = hidden.dtype

    if compute_dtype is not None:
        hidden = hidden.astype(compute_dtype)
        cell = cell.astype(compute_dtype)
        wh = wh.astype(compute_dtype)
        wc = wc.astype(compute_dtype)

    act_dtype = hidden.dtype
    act_bytes = jnp.dtype(act_dtype).itemsize
    out_bytes = jnp.dtype(out_dtype).itemsize
    w_bytes = jnp.dtype(wh.dtype).itemsize

    # Biases as f32 rows for the f32 bias+ReLU epilogue.
    bh_row = bh.astype(jnp.float32).reshape(1, DH)
    bc_row = bc.astype(jnp.float32).reshape(1, DH)

    # ---- tiling / VMEM policy -------------------------------------------
    sub = _sublane_multiple(act_dtype)
    capacity = _vmem_capacity_bytes()
    # Leave headroom for compiler scratch & framework:
    #   v7x (64 MiB) -> 48 MiB, v5e/v6e (128 MiB) -> 104 MiB.
    vmem_limit = max(capacity - capacity // 8 - 8 * 1024 * 1024,
                     32 * 1024 * 1024)
    if block_b is None:
        block_b = 512 if capacity >= 96 * 1024 * 1024 else 256

    B_pad = _round_up(B, sub)

    # Per-step VMEM (weights counted double-buffered to stay conservative in
    # case single-buffering is unavailable).
    resident_bytes = 2 * (2 * EH * DH) * w_bytes * 2 + 2 * DH * 4
    per_row_bytes = 2 * (4 * EH * act_bytes) + 2 * (2 * DH * out_bytes)
    avail = vmem_limit - resident_bytes
    if avail >= per_row_bytes * sub:
        tm_vmem = (avail // per_row_bytes) // sub * sub
    else:
        tm_vmem = sub
    tm_cap = max(sub, min(block_b, tm_vmem, B_pad))

    n_tiles = _cdiv(B_pad, tm_cap)
    if B_pad >= 2 * sub:
        n_tiles = max(n_tiles, 2)       # keep both v7x TensorCores busy
    TM = _round_up(_cdiv(B_pad, n_tiles), sub)
    grid_n = _cdiv(B_pad, TM)
    B_work = grid_n * TM                # waste < TM rows, not < block_b rows

    # Four 2-D activation slabs (cheap views of the (2, B, EH) inputs).
    h0, h1 = hidden[0], hidden[1]
    c0, c1 = cell[0], cell[1]
    if B_work != B:
        pad = ((0, B_work - B), (0, 0))
        h0, h1 = jnp.pad(h0, pad), jnp.pad(h1, pad)
        c0, c1 = jnp.pad(c0, pad), jnp.pad(c1, pad)

    split_outputs = DH >= 128           # separate lane-dense outputs

    cost = pl.CostEstimate(
        flops=2 * 2 * B_work * (2 * EH) * DH,     # two (B, 2EH)x(2EH, DH) GEMMs
        transcendentals=0,
        bytes_accessed=(4 * B_work * EH * act_bytes
                        + 2 * (2 * EH * DH) * w_bytes
                        + 2 * DH * 4
                        + 2 * B_work * DH * out_bytes),
    )

    def make_call(single_buffer_resident):
        # Constant-index (grid-resident) operands: request a single VMEM
        # buffer so big weights don't get double-buffered (halves their
        # footprint -> bigger TM fits, important on v7x's 64 MiB VMEM).
        res_kw = ({"pipeline_mode": pl.Buffered(1)}
                  if single_buffer_resident else {})
        act_spec = pl.BlockSpec((TM, EH), lambda i: (i, 0))
        w_spec = pl.BlockSpec((2 * EH, DH), lambda i: (0, 0), **res_kw)
        b_spec = pl.BlockSpec((1, DH), lambda i: (0, 0), **res_kw)
        in_specs = [act_spec, act_spec, act_spec, act_spec,
                    w_spec, w_spec, b_spec, b_spec]
        if split_outputs:
            kernel = _kernel_split
            out_specs = (pl.BlockSpec((TM, DH), lambda i: (i, 0)),
                         pl.BlockSpec((TM, DH), lambda i: (i, 0)))
            out_shape = (jax.ShapeDtypeStruct((B_work, DH), out_dtype),
                         jax.ShapeDtypeStruct((B_work, DH), out_dtype))
        else:
            kernel = _kernel_fused
            out_specs = pl.BlockSpec((TM, 2 * DH), lambda i: (i, 0))
            out_shape = jax.ShapeDtypeStruct((B_work, 2 * DH), out_dtype)
        return pl.pallas_call(
            kernel,
            grid=(grid_n,),
            in_specs=in_specs,
            out_specs=out_specs,
            out_shape=out_shape,
            compiler_params=pltpu.CompilerParams(
                dimension_semantics=("parallel",),
                vmem_limit_bytes=int(vmem_limit)),
            cost_estimate=cost,
        )

    args = (h0, h1, c0, c1, wh, wc, bh_row, bc_row)
    try:
        out = make_call(True)(*args)
    except Exception:
        # Fallback if single-buffered pipeline_mode is unsupported: default
        # (double) buffering, already accounted for in the VMEM budget.
        out = make_call(False)(*args)

    if split_outputs:
        out_h, out_c = out
        if B_work != B:
            out_h, out_c = out_h[:B], out_c[:B]
    else:
        out_h, out_c = out[:B, :DH], out[:B, DH:]
    return out_h, out_c


def _reference(hidden, cell, wh, bh, wc, bc):
    h_cat = jnp.concatenate([hidden[0], hidden[1]], axis=-1)
    c_cat = jnp.concatenate([cell[0], cell[1]], axis=-1)
    oh = jnp.maximum(h_cat @ wh + bh, 0.0)
    oc = jnp.maximum(c_cat @ wc + bc, 0.0)
    return oh, oc


def _make_inputs(key, B, EH, DH):
    k1, k2, k3, k4, k5, k6 = jax.random.split(key, 6)
    hidden = jax.random.normal(k1, (2, B, EH), dtype=jnp.float32)
    cell = jax.random.normal(k2, (2, B, EH), dtype=jnp.float32)
    # PyTorch-style Linear init: uniform(-1/sqrt(fan_in), 1/sqrt(fan_in)).
    bound = 1.0 / jnp.sqrt(2.0 * EH)
    wh = jax.random.uniform(k3, (2 * EH, DH), jnp.float32, -bound, bound)
    bh = jax.random.uniform(k4, (DH,), jnp.float32, -bound, bound)
    wc = jax.random.uniform(k5, (2 * EH, DH), jnp.float32, -bound, bound)
    bc = jax.random.uniform(k6, (DH,), jnp.float32, -bound, bound)
    return hidden, cell, wh, bh, wc, bc


if __name__ == "__main__":
    key = jax.random.PRNGKey(0)
    k1, k2 = jax.random.split(key)

    # Case 1: small module shapes (B=8, EH=32, DH=32)
    #         -> fused small-DH output, merged K=2*EH MXU pass.
    hidden, cell, wh, bh, wc, bc = _make_inputs(k1, 8, 32, 32)
    out_h, out_c = reduce_encoder(hidden, cell, wh, bh, wc, bc)
    jax.block_until_ready((out_h, out_c))
    ref_h, ref_c = _reference(hidden, cell, wh, bh, wc, bc)
    assert out_h.shape == (8, 32) and out_c.shape == (8, 32)
    assert jnp.allclose(out_h, ref_h, atol=1e-5, rtol=1e-5)
    assert jnp.allclose(out_c, ref_c, atol=1e-5, rtol=1e-5)

    # Case 2: B not a tile multiple, DH >= 128
    #         -> separate lane-dense outputs, split-K weights, 2-tile grid.
    hidden2, cell2, wh2, bh2, wc2, bc2 = _make_inputs(k2, 40, 160, 128)
    out_h2, out_c2 = reduce_encoder(hidden2, cell2, wh2, bh2, wc2, bc2)
    jax.block_until_ready((out_h2, out_c2))
    ref_h2, ref_c2 = _reference(hidden2, cell2, wh2, bh2, wc2, bc2)
    assert out_h2.shape == (40, 128) and out_c2.shape == (40, 128)
    assert jnp.allclose(out_h2, ref_h2, atol=5e-4, rtol=5e-4)
    assert jnp.allclose(out_c2, ref_c2, atol=5e-4, rtol=5e-4)

    # Case 3: bf16 compute path (recommended on v6e/v7x): bf16 DMA/MXU,
    #         f32 accumulation + f32 bias/ReLU epilogue, f32 outputs.
    out_h3, out_c3 = reduce_encoder(hidden, cell, wh, bh, wc, bc,
                                    compute_dtype=jnp.bfloat16)
    jax.block_until_ready((out_h3, out_c3))
    assert out_h3.dtype == jnp.float32 and out_c3.dtype == jnp.float32
    assert jnp.allclose(out_h3, ref_h, atol=5e-2, rtol=5e-2)
    assert jnp.allclose(out_c3, ref_c, atol=5e-2, rtol=5e-2)

    print("KERNEL_OK")
</pallas_src>

<mosaic_0001>
module attributes {stable_mosaic.version = 11 : i64} {
  func.func @_kernel_fused(%arg0: i32, %arg1: memref<8x32xf32, #tpu.memory_space<vmem>>, %arg2: memref<8x32xf32, #tpu.memory_space<vmem>>, %arg3: memref<8x32xf32, #tpu.memory_space<vmem>>, %arg4: memref<8x32xf32, #tpu.memory_space<vmem>>, %arg5: memref<64x32xf32, #tpu.memory_space<vmem>>, %arg6: memref<64x32xf32, #tpu.memory_space<vmem>>, %arg7: memref<1x32xf32, #tpu.memory_space<vmem>>, %arg8: memref<1x32xf32, #tpu.memory_space<vmem>>, %arg9: memref<8x64xf32, #tpu.memory_space<vmem>>) attributes {dimension_semantics = [#tpu.dimension_semantics<parallel>], iteration_bounds = array<i64: 1>, scalar_prefetch = 0 : i64, scratch_operands = 0 : i64, tpu.core_type = #tpu.core_type<tc>, window_params = [{transform_indices = @transform_0, window_bounds = array<i64: 8, 32>}, {transform_indices = @transform_1, window_bounds = array<i64: 8, 32>}, {transform_indices = @transform_2, window_bounds = array<i64: 8, 32>}, {transform_indices = @transform_3, window_bounds = array<i64: 8, 32>}, {pipeline_mode = #tpu.pipeline_mode<synchronous>, transform_indices = @transform_4, window_bounds = array<i64: 64, 32>}, {pipeline_mode = #tpu.pipeline_mode<synchronous>, transform_indices = @transform_5, window_bounds = array<i64: 64, 32>}, {pipeline_mode = #tpu.pipeline_mode<synchronous>, transform_indices = @transform_6, window_bounds = array<i64: 1, 32>}, {pipeline_mode = #tpu.pipeline_mode<synchronous>, transform_indices = @transform_7, window_bounds = array<i64: 1, 32>}, {transform_indices = @transform_8, window_bounds = array<i64: 8, 64>}]} {
    %c0 = arith.constant 0 : index
    %c0_0 = arith.constant 0 : index
    %0 = vector.load %arg1[%c0, %c0_0] : memref<8x32xf32, #tpu.memory_space<vmem>>, vector<8x32xf32>
    %c0_1 = arith.constant 0 : index
    %c0_2 = arith.constant 0 : index
    %1 = vector.load %arg2[%c0_1, %c0_2] : memref<8x32xf32, #tpu.memory_space<vmem>>, vector<8x32xf32>
    %c0_3 = arith.constant 0 : index
    %c0_4 = arith.constant 0 : index
    %2 = vector.load %arg7[%c0_3, %c0_4] : memref<1x32xf32, #tpu.memory_space<vmem>>, vector<1x32xf32>
    %3 = tpu.concatenate %0, %1 in 1 : vector<8x32xf32>, vector<8x32xf32> -> vector<8x64xf32>
    %c0_5 = arith.constant 0 : index
    %c0_6 = arith.constant 0 : index
    %4 = vector.load %arg5[%c0_5, %c0_6] : memref<64x32xf32, #tpu.memory_space<vmem>>, vector<64x32xf32>
    %cst = arith.constant dense<0.000000e+00> : vector<8x32xf32>
    %5 = tpu.matmul %3, %4, %cst {dimension_numbers = #tpu.dot_dimension_numbers<[1], [0], [0], [1], [0, 0, 1, 1], [], []>} : vector<8x64xf32>, vector<64x32xf32>, vector<8x32xf32> -> vector<8x32xf32>
    %6 = vector.broadcast %2 : vector<1x32xf32> to vector<8x32xf32>
    %7 = arith.addf %5, %6 : vector<8x32xf32>
    %cst_7 = arith.constant 0.000000e+00 : f32
    %8 = vector.broadcast %cst_7 : f32 to vector<8x32xf32>
    %9 = arith.maximumf %7, %8 : vector<8x32xf32>
    %c0_8 = arith.constant 0 : index
    %c0_9 = arith.constant 0 : index
    %10 = vector.load %arg3[%c0_8, %c0_9] : memref<8x32xf32, #tpu.memory_space<vmem>>, vector<8x32xf32>
    %c0_10 = arith.constant 0 : index
    %c0_11 = arith.constant 0 : index
    %11 = vector.load %arg4[%c0_10, %c0_11] : memref<8x32xf32, #tpu.memory_space<vmem>>, vector<8x32xf32>
    %c0_12 = arith.constant 0 : index
    %c0_13 = arith.constant 0 : index
    %12 = vector.load %arg8[%c0_12, %c0_13] : memref<1x32xf32, #tpu.memory_space<vmem>>, vector<1x32xf32>
    %13 = tpu.concatenate %10, %11 in 1 : vector<8x32xf32>, vector<8x32xf32> -> vector<8x64xf32>
    %c0_14 = arith.constant 0 : index
    %c0_15 = arith.constant 0 : index
    %14 = vector.load %arg6[%c0_14, %c0_15] : memref<64x32xf32, #tpu.memory_space<vmem>>, vector<64x32xf32>
    %cst_16 = arith.constant dense<0.000000e+00> : vector<8x32xf32>
    %15 = tpu.matmul %13, %14, %cst_16 {dimension_numbers = #tpu.dot_dimension_numbers<[1], [0], [0], [1], [0, 0, 1, 1], [], []>} : vector<8x64xf32>, vector<64x32xf32>, vector<8x32xf32> -> vector<8x32xf32>
    %16 = vector.broadcast %12 : vector<1x32xf32> to vector<8x32xf32>
    %17 = arith.addf %15, %16 : vector<8x32xf32>
    %cst_17 = arith.constant 0.000000e+00 : f32
    %18 = vector.broadcast %cst_17 : f32 to vector<8x32xf32>
    %19 = arith.maximumf %17, %18 : vector<8x32xf32>
    %20 = tpu.concatenate %9, %19 in 1 : vector<8x32xf32>, vector<8x32xf32> -> vector<8x64xf32>
    %c0_18 = arith.constant 0 : index
    %c0_19 = arith.constant 0 : index
    %21 = vector.load %arg9[%c0_18, %c0_19] : memref<8x64xf32, #tpu.memory_space<vmem>>, vector<8x64xf32>
    tpu.vector_store %arg9[%c0_18, %c0_19], %20 {strides = array<i32>} : memref<8x64xf32, #tpu.memory_space<vmem>>, vector<8x64xf32>,
    return
  }
  func.func @transform_0(%arg0: i32) -> (i32, i32) {
    %c0_i32 = arith.constant 0 : i32
    %c0_i32_0 = arith.constant 0 : i32
    return %arg0, %c0_i32 : i32, i32
  }
  func.func @transform_1(%arg0: i32) -> (i32, i32) {
    %c0_i32 = arith.constant 0 : i32
    %c0_i32_0 = arith.constant 0 : i32
    return %arg0, %c0_i32 : i32, i32
  }
  func.func @transform_2(%arg0: i32) -> (i32, i32) {
    %c0_i32 = arith.constant 0 : i32
    %c0_i32_0 = arith.constant 0 : i32
    return %arg0, %c0_i32 : i32, i32
  }
  func.func @transform_3(%arg0: i32) -> (i32, i32) {
    %c0_i32 = arith.constant 0 : i32
    %c0_i32_0 = arith.constant 0 : i32
    return %arg0, %c0_i32 : i32, i32
  }
  func.func @transform_4(%arg0: i32) -> (i32, i32) {
    %c0_i32 = arith.constant 0 : i32
    %c0_i32_0 = arith.constant 0 : i32
    %c0_i32_1 = arith.constant 0 : i32
    return %c0_i32, %c0_i32_0 : i32, i32
  }
  func.func @transform_5(%arg0: i32) -> (i32, i32) {
    %c0_i32 = arith.constant 0 : i32
    %c0_i32_0 = arith.constant 0 : i32
    %c0_i32_1 = arith.constant 0 : i32
    return %c0_i32, %c0_i32_0 : i32, i32
  }
  func.func @transform_6(%arg0: i32) -> (i32, i32) {
    %c0_i32 = arith.constant 0 : i32
    %c0_i32_0 = arith.constant 0 : i32
    %c0_i32_1 = arith.constant 0 : i32
    return %c0_i32, %c0_i32_0 : i32, i32
  }
  func.func @transform_7(%arg0: i32) -> (i32, i32) {
    %c0_i32 = arith.constant 0 : i32
    %c0_i32_0 = arith.constant 0 : i32
    %c0_i32_1 = arith.constant 0 : i32
    return %c0_i32, %c0_i32_0 : i32, i32
  }
  func.func @transform_8(%arg0: i32) -> (i32, i32) {
    %c0_i32 = arith.constant 0 : i32
    %c0_i32_0 = arith.constant 0 : i32
    return %arg0, %c0_i32 : i32, i32
  }
}

module attributes {stable_mosaic.version = 11 : i64} {
  func.func @_kernel_fused(%arg0: i32, %arg1: memref<8x32xf32, #tpu.memory_space<vmem>>, %arg2: memref<8x32xf32, #tpu.memory_space<vmem>>, %arg3: memref<8x32xf32, #tpu.memory_space<vmem>>, %arg4: memref<8x32xf32, #tpu.memory_space<vmem>>, %arg5: memref<64x32xf32, #tpu.memory_space<vmem>>, %arg6: memref<64x32xf32, #tpu.memory_space<vmem>>, %arg7: memref<1x32xf32, #tpu.memory_space<vmem>>, %arg8: memref<1x32xf32, #tpu.memory_space<vmem>>, %arg9: memref<8x64xf32, #tpu.memory_space<vmem>>) attributes {dimension_semantics = [#tpu.dimension_semantics<parallel>], iteration_bounds = array<i64: 1>, scalar_prefetch = 0 : i64, scratch_operands = 0 : i64, tpu.core_type = #tpu.core_type<tc>, window_params = [{transform_indices = @transform_0, window_bounds = array<i64: 8, 32>}, {transform_indices = @transform_1, window_bounds = array<i64: 8, 32>}, {transform_indices = @transform_2, window_bounds = array<i64: 8, 32>}, {transform_indices = @transform_3, window_bounds = array<i64: 8, 32>}, {pipeline_mode = #tpu.pipeline_mode<synchronous>, transform_indices = @transform_4, window_bounds = array<i64: 64, 32>}, {pipeline_mode = #tpu.pipeline_mode<synchronous>, transform_indices = @transform_5, window_bounds = array<i64: 64, 32>}, {pipeline_mode = #tpu.pipeline_mode<synchronous>, transform_indices = @transform_6, window_bounds = array<i64: 1, 32>}, {pipeline_mode = #tpu.pipeline_mode<synchronous>, transform_indices = @transform_7, window_bounds = array<i64: 1, 32>}, {transform_indices = @transform_8, window_bounds = array<i64: 8, 64>}]} {
    %c0 = arith.constant 0 : index
    %c0_0 = arith.constant 0 : index
    %0 = vector.load %arg1[%c0, %c0_0] : memref<8x32xf32, #tpu.memory_space<vmem>>, vector<8x32xf32>
    %c0_1 = arith.constant 0 : index
    %c0_2 = arith.constant 0 : index
    %1 = vector.load %arg2[%c0_1, %c0_2] : memref<8x32xf32, #tpu.memory_space<vmem>>, vector<8x32xf32>
    %c0_3 = arith.constant 0 : index
    %c0_4 = arith.constant 0 : index
    %2 = vector.load %arg7[%c0_3, %c0_4] : memref<1x32xf32, #tpu.memory_space<vmem>>, vector<1x32xf32>
    %3 = tpu.concatenate %0, %1 in 1 : vector<8x32xf32>, vector<8x32xf32> -> vector<8x64xf32>
    %c0_5 = arith.constant 0 : index
    %c0_6 = arith.constant 0 : index
    %4 = vector.load %arg5[%c0_5, %c0_6] : memref<64x32xf32, #tpu.memory_space<vmem>>, vector<64x32xf32>
    %cst = arith.constant dense<0.000000e+00> : vector<8x32xf32>
    %5 = tpu.matmul %3, %4, %cst {dimension_numbers = #tpu.dot_dimension_numbers<[1], [0], [0], [1], [0, 0, 1, 1], [], []>} : vector<8x64xf32>, vector<64x32xf32>, vector<8x32xf32> -> vector<8x32xf32>
    %6 = vector.broadcast %2 : vector<1x32xf32> to vector<8x32xf32>
    %7 = arith.addf %5, %6 : vector<8x32xf32>
    %cst_7 = arith.constant 0.000000e+00 : f32
    %8 = vector.broadcast %cst_7 : f32 to vector<8x32xf32>
    %9 = arith.maximumf %7, %8 : vector<8x32xf32>
    %c0_8 = arith.constant 0 : index
    %c0_9 = arith.constant 0 : index
    %10 = vector.load %arg3[%c0_8, %c0_9] : memref<8x32xf32, #tpu.memory_space<vmem>>, vector<8x32xf32>
    %c0_10 = arith.constant 0 : index
    %c0_11 = arith.constant 0 : index
    %11 = vector.load %arg4[%c0_10, %c0_11] : memref<8x32xf32, #tpu.memory_space<vmem>>, vector<8x32xf32>
    %c0_12 = arith.constant 0 : index
    %c0_13 = arith.constant 0 : index
    %12 = vector.load %arg8[%c0_12, %c0_13] : memref<1x32xf32, #tpu.memory_space<vmem>>, vector<1x32xf32>
    %13 = tpu.concatenate %10, %11 in 1 : vector<8x32xf32>, vector<8x32xf32> -> vector<8x64xf32>
    %c0_14 = arith.constant 0 : index
    %c0_15 = arith.constant 0 : index
    %14 = vector.load %arg6[%c0_14, %c0_15] : memref<64x32xf32, #tpu.memory_space<vmem>>, vector<64x32xf32>
    %cst_16 = arith.constant dense<0.000000e+00> : vector<8x32xf32>
    %15 = tpu.matmul %13, %14, %cst_16 {dimension_numbers = #tpu.dot_dimension_numbers<[1], [0], [0], [1], [0, 0, 1, 1], [], []>} : vector<8x64xf32>, vector<64x32xf32>, vector<8x32xf32> -> vector<8x32xf32>
    %16 = vector.broadcast %12 : vector<1x32xf32> to vector<8x32xf32>
    %17 = arith.addf %15, %16 : vector<8x32xf32>
    %cst_17 = arith.constant 0.000000e+00 : f32
    %18 = vector.broadcast %cst_17 : f32 to vector<8x32xf32>
    %19 = arith.maximumf %17, %18 : vector<8x32xf32>
    %20 = tpu.concatenate %9, %19 in 1 : vector<8x32xf32>, vector<8x32xf32> -> vector<8x64xf32>
    %c0_18 = arith.constant 0 : index
    %c0_19 = arith.constant 0 : index
    %21 = vector.load %arg9[%c0_18, %c0_19] : memref<8x64xf32, #tpu.memory_space<vmem>>, vector<8x64xf32>
    tpu.vector_store %arg9[%c0_18, %c0_19], %20 {strides = array<i32>} : memref<8x64xf32, #tpu.memory_space<vmem>>, vector<8x64xf32>,
    return
  }
  func.func @transform_0(%arg0: i32) -> (i32, i32) {
    %c0_i32 = arith.constant 0 : i32
    %c0_i32_0 = arith.constant 0 : i32
    return %arg0, %c0_i32 : i32, i32
  }
  func.func @transform_1(%arg0: i32) -> (i32, i32) {
    %c0_i32 = arith.constant 0 : i32
    %c0_i32_0 = arith.constant 0 : i32
    return %arg0, %c0_i32 : i32, i32
  }
  func.func @transform_2(%arg0: i32) -> (i32, i32) {
    %c0_i32 = arith.constant 0 : i32
    %c0_i32_0 = arith.constant 0 : i32
    return %arg0, %c0_i32 : i32, i32
  }
  func.func @transform_3(%arg0: i32) -> (i32, i32) {
    %c0_i32 = arith.constant 0 : i32
    %c0_i32_0 = arith.constant 0 : i32
    return %arg0, %c0_i32 : i32, i32
  }
  func.func @transform_4(%arg0: i32) -> (i32, i32) {
    %c0_i32 = arith.constant 0 : i32
    %c0_i32_0 = arith.constant 0 : i32
    %c0_i32_1 = arith.constant 0 : i32
    return %c0_i32, %c0_i32_0 : i32, i32
  }
  func.func @transform_5(%arg0: i32) -> (i32, i32) {
    %c0_i32 = arith.constant 0 : i32
    %c0_i32_0 = arith.constant 0 : i32
    %c0_i32_1 = arith.constant 0 : i32
    return %c0_i32, %c0_i32_0 : i32, i32
  }
  func.func @transform_6(%arg0: i32) -> (i32, i32) {
    %c0_i32 = arith.constant 0 : i32
    %c0_i32_0 = arith.constant 0 : i32
    %c0_i32_1 = arith.constant 0 : i32
    return %c0_i32, %c0_i32_0 : i32, i32
  }
  func.func @transform_7(%arg0: i32) -> (i32, i32) {
    %c0_i32 = arith.constant 0 : i32
    %c0_i32_0 = arith.constant 0 : i32
    %c0_i32_1 = arith.constant 0 : i32
    return %c0_i32, %c0_i32_0 : i32, i32
  }
  func.func @transform_8(%arg0: i32) -> (i32, i32) {
    %c0_i32 = arith.constant 0 : i32
    %c0_i32_0 = arith.constant 0 : i32
    return %arg0, %c0_i32 : i32, i32
  }
}

</mosaic_0001>

<bundles_post_ra>
// kernel: tpu_custom_call.1
= control target key start
LH: loop header
LB: loop body
LE: loop exit
PB: predicated region body
PF: predicated region fallthrough
CT: control target
= control target key end

     0   :  { %s330_s9 = smov 32   ;;  %v331_v2 = vmov 0.0   ;;  %vm332_vm0 = vmmov 0   ;;  %s459_s0 = inlined_call_operand.vmem [shape: f32[8,32], index: 0, kind: input, shape index: {}]   ;;  %s460_s1 = inlined_call_operand.vmem [shape: f32[8,32], index: 1, kind: input, shape index: {}]   ;;  %s461_s2 = inlined_call_operand.vmem [shape: f32[8,32], index: 2, kind: input, shape index: {}]   ;;  %s462_s3 = inlined_call_operand.vmem [shape: f32[8,32], index: 3, kind: input, shape index: {}]   ;;  %s463_s4 = inlined_call_operand.vmem [shape: f32[64,32], index: 4, kind: input, shape index: {}]   ;;  %s464_s5 = inlined_call_operand.vmem [shape: f32[64,32], index: 5, kind: input, shape index: {}]   ;;  %s465_s6 = inlined_call_operand.vmem [shape: f32[1,32], index: 6, kind: input, shape index: {}]   ;;  %s466_s7 = inlined_call_operand.vmem [shape: f32[1,32], index: 7, kind: input, shape index: {}]   ;;  %s467_s8 = inlined_call_operand.hbm [shape: f32[8,64], index: 8, kind: output, shape index: {}]  }
   0x1   :  { %v129_v0 = vld [vmem:[%s462_s3] sm:$0xff]  ;;  %v143_v1 = vld [vmem:[%s464_s5 + $0x38] sm:$0xff]  ;;  %285 = vmatprep.subr.mxu1 %v331_v2  ;;  %v142_v3 = vld [vmem:[%s464_s5 + $0x30] sm:$0xff]  ;;  %301 = vmatprep.mubr.msk.f32.mxu1 %vm332_vm0, %v331_v2 }
   0x2   :  { %132 = vrot.lane.b32.xlu0 %v129_v0, %s330_s9  ;;  %286 = vmatpush3.msra.mxu1 %v143_v1  ;;  %v31_v4 = vld [vmem:[%s460_s1] sm:$0xff]  ;;  %v141_v5 = vld [vmem:[%s464_s5 + $0x28] sm:$0xff]  ;;  %v46_v6 = vld [vmem:[%s463_s4 + $0x38] sm:$0xff] }
   0x3   :  { %287 = vmatprep.subr.mxu1 %v331_v2  ;;  %266 = vmatprep.subr.mxu0 %v331_v2  ;;  %v45_v7 = vld [vmem:[%s463_s4 + $0x30] sm:$0xff]  ;;  %v140_v8 = vld [vmem:[%s464_s5 + $0x20] sm:$0xff]  ;;  %v44_v9 = vld [vmem:[%s463_s4 + $0x28] sm:$0xff] }
   0x4   :  { %288 = vmatpush3.msra.mxu1 %v142_v3  ;;  %267 = vmatpush3.msra.mxu0 %v46_v6  ;;  %v139_v10 = vld [vmem:[%s464_s5 + $0x18] sm:$0xff] }
   0x5   :  { %289 = vmatprep.subr.mxu1 %v331_v2  ;;  %268 = vmatprep.subr.mxu0 %v331_v2 }
   0x6   :  { %34 = vrot.lane.b32.xlu0 %v31_v4, %s330_s9  ;;  %290 = vmatpush3.msra.mxu1 %v141_v5 }
   0x7   :  { %291 = vmatprep.subr.mxu1 %v331_v2  ;;  %269 = vmatpush3.msra.mxu0 %v45_v7 }
   0x8   :  { %13 = vsyncpa [#allocation3], 0  ;;  %292 = vmatpush3.msra.mxu1 %v140_v8  ;;  %270 = vmatprep.subr.mxu0 %v331_v2  ;;  %v43_v11 = vld [vmem:[%s463_s4 + $0x20] sm:$0xff]  ;;  %v138_v12 = vld [vmem:[%s464_s5 + $0x10] sm:$0xff]  ;;  %vm37_vm1 = vcmask 261120   ;;  %vm53_vm2 = vcmask 523264  }
   0x9   :  { %293 = vmatprep.subr.mxu1 %v331_v2  ;;  %271 = vmatpush3.msra.mxu0 %v44_v9  ;;  %v42_v13 = vld [vmem:[%s463_s4 + $0x18] sm:$0xff]  ;;  %v137_v14 = vld [vmem:[%s464_s5 + $0x8] sm:$0xff]  ;;  %v41_v15 = vld [vmem:[%s463_s4 + $0x10] sm:$0xff] }
   0xa   :  { %294 = vmatpush3.msra.mxu1 %v139_v10  ;;  %272 = vmatprep.subr.mxu0 %v331_v2  ;;  %v136_v16 = vld [vmem:[%s464_s5] sm:$0xff]  ;;  %v40_v17 = vld [vmem:[%s463_s4 + $0x8] sm:$0xff] }
   0xb   :  { %295 = vmatprep.subr.mxu1 %v331_v2  ;;  %273 = vmatpush3.msra.mxu0 %v43_v11  ;;  %v39_v18 = vld [vmem:[%s463_s4] sm:$0xff] }
   0xc   :  { %296 = vmatpush3.msra.mxu1 %v138_v12  ;;  %274 = vmatprep.subr.mxu0 %v331_v2  ;;  %v128_v19 = vld [vmem:[%s461_s2] sm:$0xff] }
   0xd   :  { %297 = vmatprep.subr.mxu1 %v331_v2  ;;  %275 = vmatpush3.msra.mxu0 %v42_v13  ;;  %v30_v22 = vld [vmem:[%s459_s0] sm:$0xff]  ;;  %s333_s0 = smov [#allocation2]  }
   0xe   :  { %298 = vmatpush3.msra.mxu1 %v137_v14  ;;  %276 = vmatprep.subr.mxu0 %v331_v2  ;;  %v246_v25 = vld [vmem:[%s466_s7] ss:$0 sm:$0xff]  ;;  %s236_s22 = sshll.u32 %s333_s0, 4  ;;  %s237_s22 = int_to_ptr.vmem [resolvable:$true] %s236_s22 }
   0xf   :  { %299 = vmatprep.subr.mxu1 %v331_v2  ;;  %277 = vmatpush3.msra.mxu0 %v41_v15  ;;  %v244_v32 = vld [vmem:[%s465_s6] ss:$0 sm:$0xff]  ;;  %s308_s7 = scalar_lea.vmem %s237_s22, 128  ;;  %p313_p1 = scmp.lt.s32.totalorder %s237_s22, %s237_s22 }
  0x10   :  { %300 = vmatpush3.msra.mxu1 %v136_v16  ;;  %278 = vmatprep.subr.mxu0 %v331_v2  ;;  %p309_p0 = scmp.ne.s32.totalorder %s237_s22, %s308_s7  ;;  %p314_p2 = scmp.lt.s32.totalorder %s308_s7, %s308_s7 }
  0x11   :  { %279 = vmatpush3.msra.mxu0 %v40_v17  ;;  %282 = vmatprep.mubr.msk.f32.mxu0 %vm332_vm0, %v331_v2 }
  0x12   :  { %280 = vmatprep.subr.mxu0 %v331_v2  ;;  %p315_p3 = por %p314_p2, %p313_p1 }
  0x13   :  { %281 = vmatpush3.msra.mxu0 %v39_v18 }
  0x14   :  { %p316_p4 = pnand %p315_p3, %p309_p0 }
  0x74   :  { %v133_v20 = vpop.permute.xlu0 %132 }
  0x75   :  { %v135_v21 = vsel %vm37_vm1, %v128_v19, %v133_v20 }
  0x76   :  { %302 = vmatmul.mubr.msk.f32.vlgmr.msra.gmra.mxu1 %vm53_vm2, %v135_v21 }
  0x78   :  { %v35_v23 = vpop.permute.xlu0 %34 }
  0x79   :  { %v38_v24 = vsel %vm37_vm1, %v30_v22, %v35_v23 }
  0x7a   :  { %283 = vmatmul.mubr.msk.f32.vlgmr.msra.gmra.mxu0 %vm53_vm2, %v38_v24 }
 0x136   :  { %v219_v26 = vpop.f32.mrf.mxu1 }
 0x137   :  { %v220_v27 = vadd.f32 %v246_v25, %v219_v26 }
 0x138   :  { %v303_v28 = vpop.f32.mrf.mxu1 }
 0x139   :  { %v223_v29 = vmax.f32 %v220_v27, 0.0 }
 0x13a   :  { %v123_v30 = vpop.f32.mrf.mxu0 }
 0x13b   :  { %225 = vrot.lane.b32.xlu1 %v223_v29, %s330_s9  ;;  %v124_v33 = vadd.f32 %v244_v32, %v123_v30 }
 0x13c   :  { %v284_v31 = vpop.f32.mrf.mxu0 }
 0x13d   :  { %v127_v34 = vmax.f32 %v124_v33, 0.0 }
 0x1ad   :  { %v226_v35 = vpop.permute.xlu1 %225 }
 0x1ae   :  { %v228_v36 = vsel %vm37_vm1, %v127_v34, %v226_v35 }
 0x1af   :  { %229 = vst.msk [vmem:[#allocation2] sm:$0xff] %vm53_vm2, %v228_v36 }
 0x1b0   :  { %319 = shalt.err (!%p316_p4)
}
 0x1b1   :  { %239 = dma.vmem_to_hbm [thread:$0]  %s237_s22, 128, %s467_s8, [#allocation3]  }
 0x1b2   :  { %328 = dma.done.wait [#allocation3], 128  }
 0x1b3   :  { %329 = vsyncadd [#allocation3], 4294967168 }
 0x1b4   :  { %243 = vsyncpa [#allocation3], 1 }

// kernel: tpu_custom_call.1
= control target key start
LH: loop header
LB: loop body
LE: loop exit
PB: predicated region body
PF: predicated region fallthrough
CT: control target
= control target key end

     0   :  { %s330_s9 = smov 32   ;;  %v331_v2 = vmov 0.0   ;;  %vm332_vm0 = vmmov 0   ;;  %s459_s0 = inlined_call_operand.vmem [shape: f32[8,32], index: 0, kind: input, shape index: {}]   ;;  %s460_s1 = inlined_call_operand.vmem [shape: f32[8,32], index: 1, kind: input, shape index: {}]   ;;  %s461_s2 = inlined_call_operand.vmem [shape: f32[8,32], index: 2, kind: input, shape index: {}]   ;;  %s462_s3 = inlined_call_operand.vmem [shape: f32[8,32], index: 3, kind: input, shape index: {}]   ;;  %s463_s4 = inlined_call_operand.vmem [shape: f32[64,32], index: 4, kind: input, shape index: {}]   ;;  %s464_s5 = inlined_call_operand.vmem [shape: f32[64,32], index: 5, kind: input, shape index: {}]   ;;  %s465_s6 = inlined_call_operand.vmem [shape: f32[1,32], index: 6, kind: input, shape index: {}]   ;;  %s466_s7 = inlined_call_operand.vmem [shape: f32[1,32], index: 7, kind: input, shape index: {}]   ;;  %s467_s8 = inlined_call_operand.hbm [shape: f32[8,64], index: 8, kind: output, shape index: {}]  }
   0x1   :  { %v129_v0 = vld [vmem:[%s462_s3] sm:$0xff]  ;;  %v143_v1 = vld [vmem:[%s464_s5 + $0x38] sm:$0xff]  ;;  %285 = vmatprep.subr.mxu1 %v331_v2  ;;  %v142_v3 = vld [vmem:[%s464_s5 + $0x30] sm:$0xff]  ;;  %301 = vmatprep.mubr.msk.f32.mxu1 %vm332_vm0, %v331_v2 }
   0x2   :  { %132 = vrot.lane.b32.xlu0 %v129_v0, %s330_s9  ;;  %286 = vmatpush3.msra.mxu1 %v143_v1  ;;  %v31_v4 = vld [vmem:[%s460_s1] sm:$0xff]  ;;  %v141_v5 = vld [vmem:[%s464_s5 + $0x28] sm:$0xff]  ;;  %v46_v6 = vld [vmem:[%s463_s4 + $0x38] sm:$0xff] }
   0x3   :  { %287 = vmatprep.subr.mxu1 %v331_v2  ;;  %266 = vmatprep.subr.mxu0 %v331_v2  ;;  %v45_v7 = vld [vmem:[%s463_s4 + $0x30] sm:$0xff]  ;;  %v140_v8 = vld [vmem:[%s464_s5 + $0x20] sm:$0xff]  ;;  %v44_v9 = vld [vmem:[%s463_s4 + $0x28] sm:$0xff] }
   0x4   :  { %288 = vmatpush3.msra.mxu1 %v142_v3  ;;  %267 = vmatpush3.msra.mxu0 %v46_v6  ;;  %v139_v10 = vld [vmem:[%s464_s5 + $0x18] sm:$0xff] }
   0x5   :  { %289 = vmatprep.subr.mxu1 %v331_v2  ;;  %268 = vmatprep.subr.mxu0 %v331_v2 }
   0x6   :  { %34 = vrot.lane.b32.xlu0 %v31_v4, %s330_s9  ;;  %290 = vmatpush3.msra.mxu1 %v141_v5 }
   0x7   :  { %291 = vmatprep.subr.mxu1 %v331_v2  ;;  %269 = vmatpush3.msra.mxu0 %v45_v7 }
   0x8   :  { %13 = vsyncpa [#allocation3], 0  ;;  %292 = vmatpush3.msra.mxu1 %v140_v8  ;;  %270 = vmatprep.subr.mxu0 %v331_v2  ;;  %v43_v11 = vld [vmem:[%s463_s4 + $0x20] sm:$0xff]  ;;  %v138_v12 = vld [vmem:[%s464_s5 + $0x10] sm:$0xff]  ;;  %vm37_vm1 = vcmask 261120   ;;  %vm53_vm2 = vcmask 523264  }
   0x9   :  { %293 = vmatprep.subr.mxu1 %v331_v2  ;;  %271 = vmatpush3.msra.mxu0 %v44_v9  ;;  %v42_v13 = vld [vmem:[%s463_s4 + $0x18] sm:$0xff]  ;;  %v137_v14 = vld [vmem:[%s464_s5 + $0x8] sm:$0xff]  ;;  %v41_v15 = vld [vmem:[%s463_s4 + $0x10] sm:$0xff] }
   0xa   :  { %294 = vmatpush3.msra.mxu1 %v139_v10  ;;  %272 = vmatprep.subr.mxu0 %v331_v2  ;;  %v136_v16 = vld [vmem:[%s464_s5] sm:$0xff]  ;;  %v40_v17 = vld [vmem:[%s463_s4 + $0x8] sm:$0xff] }
   0xb   :  { %295 = vmatprep.subr.mxu1 %v331_v2  ;;  %273 = vmatpush3.msra.mxu0 %v43_v11  ;;  %v39_v18 = vld [vmem:[%s463_s4] sm:$0xff] }
   0xc   :  { %296 = vmatpush3.msra.mxu1 %v138_v12  ;;  %274 = vmatprep.subr.mxu0 %v331_v2  ;;  %v128_v19 = vld [vmem:[%s461_s2] sm:$0xff] }
   0xd   :  { %297 = vmatprep.subr.mxu1 %v331_v2  ;;  %275 = vmatpush3.msra.mxu0 %v42_v13  ;;  %v30_v22 = vld [vmem:[%s459_s0] sm:$0xff]  ;;  %s333_s0 = smov [#allocation2]  }
   0xe   :  { %298 = vmatpush3.msra.mxu1 %v137_v14  ;;  %276 = vmatprep.subr.mxu0 %v331_v2  ;;  %v246_v25 = vld [vmem:[%s466_s7] ss:$0 sm:$0xff]  ;;  %s236_s22 = sshll.u32 %s333_s0, 4  ;;  %s237_s22 = int_to_ptr.vmem [resolvable:$true] %s236_s22 }
   0xf   :  { %299 = vmatprep.subr.mxu1 %v331_v2  ;;  %277 = vmatpush3.msra.mxu0 %v41_v15  ;;  %v244_v32 = vld [vmem:[%s465_s6] ss:$0 sm:$0xff]  ;;  %s308_s7 = scalar_lea.vmem %s237_s22, 128  ;;  %p313_p1 = scmp.lt.s32.totalorder %s237_s22, %s237_s22 }
  0x10   :  { %300 = vmatpush3.msra.mxu1 %v136_v16  ;;  %278 = vmatprep.subr.mxu0 %v331_v2  ;;  %p309_p0 = scmp.ne.s32.totalorder %s237_s22, %s308_s7  ;;  %p314_p2 = scmp.lt.s32.totalorder %s308_s7, %s308_s7 }
  0x11   :  { %279 = vmatpush3.msra.mxu0 %v40_v17  ;;  %282 = vmatprep.mubr.msk.f32.mxu0 %vm332_vm0, %v331_v2 }
  0x12   :  { %280 = vmatprep.subr.mxu0 %v331_v2  ;;  %p315_p3 = por %p314_p2, %p313_p1 }
  0x13   :  { %281 = vmatpush3.msra.mxu0 %v39_v18 }
  0x14   :  { %p316_p4 = pnand %p315_p3, %p309_p0 }
  0x74   :  { %v133_v20 = vpop.permute.xlu0 %132 }
  0x75   :  { %v135_v21 = vsel %vm37_vm1, %v128_v19, %v133_v20 }
  0x76   :  { %302 = vmatmul.mubr.msk.f32.vlgmr.msra.gmra.mxu1 %vm53_vm2, %v135_v21 }
  0x78   :  { %v35_v23 = vpop.permute.xlu0 %34 }
  0x79   :  { %v38_v24 = vsel %vm37_vm1, %v30_v22, %v35_v23 }
  0x7a   :  { %283 = vmatmul.mubr.msk.f32.vlgmr.msra.gmra.mxu0 %vm53_vm2, %v38_v24 }
 0x136   :  { %v219_v26 = vpop.f32.mrf.mxu1 }
 0x137   :  { %v220_v27 = vadd.f32 %v246_v25, %v219_v26 }
 0x138   :  { %v303_v28 = vpop.f32.mrf.mxu1 }
 0x139   :  { %v223_v29 = vmax.f32 %v220_v27, 0.0 }
 0x13a   :  { %v123_v30 = vpop.f32.mrf.mxu0 }
 0x13b   :  { %225 = vrot.lane.b32.xlu1 %v223_v29, %s330_s9  ;;  %v124_v33 = vadd.f32 %v244_v32, %v123_v30 }
 0x13c   :  { %v284_v31 = vpop.f32.mrf.mxu0 }
 0x13d   :  { %v127_v34 = vmax.f32 %v124_v33, 0.0 }
 0x1ad   :  { %v226_v35 = vpop.permute.xlu1 %225 }
 0x1ae   :  { %v228_v36 = vsel %vm37_vm1, %v127_v34, %v226_v35 }
 0x1af   :  { %229 = vst.msk [vmem:[#allocation2] sm:$0xff] %vm53_vm2, %v228_v36 }
 0x1b0   :  { %319 = shalt.err (!%p316_p4)
}
 0x1b1   :  { %239 = dma.vmem_to_hbm [thread:$0]  %s237_s22, 128, %s467_s8, [#allocation3]  }
 0x1b2   :  { %328 = dma.done.wait [#allocation3], 128  }
 0x1b3   :  { %329 = vsyncadd [#allocation3], 4294967168 }
 0x1b4   :  { %243 = vsyncpa [#allocation3], 1 }

</bundles_post_ra>
